<compile_context>
chip_gen: v6e
topology: v6e:2x2x1
jax: 0.10.0
libtpu: 0.0.40
codegen_flags: <defaults>
</compile_context>

<pallas_src>
import numpy as np
import jax
import jax.numpy as jnp
from jax import lax
from jax.experimental import pallas as pl
from jax.experimental.pallas import tpu as pltpu

# ----------------------------- sizes ---------------------------------------
N_PAST = 32              # sequence length (n_past)
L1 = N_PAST              # conv1 output length (stride 1, pad 1, k 3)   -> 32
L2 = N_PAST // 2         # conv2 output length (stride 2, pad 3, k 7)   -> 16
L3 = N_PAST // 2 // 4    # conv3 output length (stride 4, pad 4, k 9)   -> 4
C1, C2, C3 = 4, 8, 16
FEAT_IN = C3 * L3        # 64
FEAT_HID = FEAT_IN // 2  # 32

LANES = 128              # padded lane width for every feature dim
TOTAL2 = C2 * L2         # 128 (conv2 flat width == one vreg lane span)

assert (L2 & (L2 - 1)) == 0, "L2 must be a power of two (bitwise pos trick)"
assert TOTAL2 == LANES

# const-slab row layout (one (16,128) f32 operand)
ROW_B1, ROW_B2, ROW_B3, ROW_BF1, ROW_WF2, ROW_BF2, ROW_MASK = 0, 1, 2, 3, 4, 5, 6
POOL_TAPS = (-2, -1, 1, 2)      # mask rows ROW_MASK+0..3, in this order
CONST_ROWS = 16                 # padded to a multiple of 8 sublanes


# ----------------------------- kernel ---------------------------------------
def ffc_kernel(x_ref, w_ref, c_ref, out_ref):
    # x_ref : (TB, 128) f32, lanes >= N_PAST are zero
    # w_ref : (4, 128, 128) bf16 -> [m1, m2, m3, wf1^T]
    # c_ref : (16, 128) f32 -> biases / fc2 row / pool masks (see ROW_*)

    # conv1 (dense matmul, bf16 operands, f32 acc) + ReLU -> (TB, C1*L1)=(TB,128)
    x = x_ref[...].astype(jnp.bfloat16)
    h1 = jnp.dot(x, w_ref[0], preferred_element_type=jnp.float32)
    h1 = jnp.maximum(h1 + c_ref[ROW_B1:ROW_B1 + 1, :], 0.0)

    # conv2 (dense matmul) -> (TB, C2*L2) = (TB, 128)
    h2 = jnp.dot(h1.astype(jnp.bfloat16), w_ref[1],
                 preferred_element_type=jnp.float32) + c_ref[ROW_B2:ROW_B2 + 1, :]

    # MaxPool1d(kernel=5, stride=1, padding=2) per channel on the flat
    # channel-major layout: 4 XLU lane rotations + precomputed additive
    # validity masks (0 for in-channel-and-in-bounds taps, -1e30 otherwise),
    # reduced with a depth-2 tree max.  The d=0 tap (h2 itself) is always
    # valid, and ReLU follows, so semantics match PyTorch's -inf padding.
    s_m2 = pltpu.roll(h2, shift=2, axis=1) + c_ref[ROW_MASK + 0:ROW_MASK + 1, :]
    s_m1 = pltpu.roll(h2, shift=1, axis=1) + c_ref[ROW_MASK + 1:ROW_MASK + 2, :]
    s_p1 = pltpu.roll(h2, shift=TOTAL2 - 1, axis=1) + c_ref[ROW_MASK + 2:ROW_MASK + 3, :]
    s_p2 = pltpu.roll(h2, shift=TOTAL2 - 2, axis=1) + c_ref[ROW_MASK + 3:ROW_MASK + 4, :]
    pooled = jnp.maximum(h2, jnp.maximum(jnp.maximum(s_m2, s_m1),
                                         jnp.maximum(s_p1, s_p2)))
    h2p = jnp.maximum(pooled, 0.0)                    # ReLU after pooling

    # conv3 (dense matmul) + ReLU -> (TB, 128); lanes >= FEAT_IN are exact 0
    # (flat index c*L3 + l == PyTorch flatten(1, 2) order)
    h3 = jnp.dot(h2p.astype(jnp.bfloat16), w_ref[2],
                 preferred_element_type=jnp.float32)
    h3 = jnp.maximum(h3 + c_ref[ROW_B3:ROW_B3 + 1, :], 0.0)

    # fc1 + ReLU -> (TB, 128); lanes >= FEAT_HID are exact 0
    f1 = jnp.dot(h3.astype(jnp.bfloat16), w_ref[3],
                 preferred_element_type=jnp.float32)
    f1 = jnp.maximum(f1 + c_ref[ROW_BF1:ROW_BF1 + 1, :], 0.0)

    # fc2: single output column -> VPU multiply + lane reduce (an MXU matmul
    # here would use only 1 result lane).  Lane-dense broadcast store.
    y = jnp.sum(f1 * c_ref[ROW_WF2:ROW_WF2 + 1, :], axis=-1, keepdims=True)
    out_ref[...] = jnp.broadcast_to(y, out_ref.shape) + c_ref[ROW_BF2:ROW_BF2 + 1, :]


# ----------------------------- wrapper ---------------------------------------
def filters_fully_connected(x, weights, consts, *, tile_b=None):
    """x: (B, N_PAST) f32.  weights: (4,128,128) bf16.  consts: (16,128) f32."""
    bsz = x.shape[0]
    if tile_b is None:
        # 256-row tiles fill the 256x256 MXU on v6e/v7x (and are a multiple of
        # 128 for v5e); tiny batches fall back to one padded-to-8 tile.
        tile_b = 256 if bsz >= 256 else max(8, pl.cdiv(bsz, 8) * 8)
    tile_b = min(tile_b, 1024)          # keep VMEM footprint trivial on v7x
    b_pad = pl.cdiv(bsz, tile_b) * tile_b

    # Lane-dense, batch-padded input (zeros are harmless: padded weight rows
    # are zero and padded batch rows are sliced away below).
    x_p = jnp.zeros((b_pad, LANES), jnp.float32)
    x_p = x_p.at[:bsz, :N_PAST].set(x.astype(jnp.float32))

    nb = b_pad // tile_b
    flops = 2 * b_pad * (4 * LANES * LANES + LANES)
    bytes_accessed = (x_p.size * 4 + int(weights.size) * 2
                      + int(consts.size) * 4 + b_pad * LANES * 4)
    cost = pl.CostEstimate(flops=flops, transcendentals=0,
                           bytes_accessed=bytes_accessed)

    out = pl.pallas_call(
        ffc_kernel,
        out_shape=jax.ShapeDtypeStruct((b_pad, LANES), jnp.float32),
        grid_spec=pltpu.PrefetchScalarGridSpec(
            num_scalar_prefetch=0,
            grid=(nb,),
            in_specs=[
                pl.BlockSpec((tile_b, LANES), lambda i: (i, 0)),       # x tile
                pl.BlockSpec((4, LANES, LANES), lambda i: (0, 0, 0)),  # weights (resident)
                pl.BlockSpec((CONST_ROWS, LANES), lambda i: (0, 0)),   # consts  (resident)
            ],
            out_specs=pl.BlockSpec((tile_b, LANES), lambda i: (i, 0)),
        ),
        compiler_params=pltpu.CompilerParams(
            dimension_semantics=("parallel",)),   # v7x: split batch over 2 TCs
        cost_estimate=cost,
    )(x_p, weights, consts)
    return out[:bsz, :1]


# ------------------- conv -> exact dense matrix (wrapper glue) ---------------
def conv1d_as_dense(w, b, L_in, stride, padding):
    """Exact dense equivalent of Conv1d on a channel-major-flattened input.

    Returns M of shape (C_in*L_in, C_out*L_out) and bias (1, C_out*L_out)
    such that  out_flat = in_flat @ M + b_flat.
    """
    w = np.asarray(w, np.float32)
    b = np.asarray(b, np.float32)
    C_out, C_in, K = w.shape
    L_out = (L_in + 2 * padding - K) // stride + 1
    M = np.zeros((C_in * L_in, C_out * L_out), dtype=np.float32)
    for co in range(C_out):
        for ci in range(C_in):
            for k in range(K):
                for o in range(L_out):
                    i = o * stride + k - padding
                    if 0 <= i < L_in:
                        M[ci * L_in + i, co * L_out + o] += w[co, ci, k]
    b_flat = np.repeat(b, L_out)[None, :].astype(np.float32)
    return M, b_flat, L_out


def pad_to(a, shape):
    """Zero-pad a float32 numpy array up to `shape` (trailing pad)."""
    a = np.asarray(a, np.float32)
    out = np.zeros(shape, np.float32)
    out[tuple(slice(0, s) for s in a.shape)] = a
    return out


def build_kernel_params(w1, b1, w2, b2, w3, b3, wf1, bf1, wf2, bf2):
    """Pack all parameters into one bf16 weight slab and one f32 const slab."""
    m1, b1f, l1 = conv1d_as_dense(w1, b1, N_PAST, 1, 1)
    m2, b2f, l2 = conv1d_as_dense(w2, b2, l1, 2, 3)
    m3, b3f, l3 = conv1d_as_dense(w3, b3, l2, 4, 4)
    assert l1 == L1 and l2 == L2 and l3 == L3 and C3 * l3 == FEAT_IN

    weights = np.stack([
        pad_to(m1, (LANES, LANES)),                           # (32,128) -> 128x128
        pad_to(m2, (LANES, LANES)),                           # 128x128
        pad_to(m3, (LANES, LANES)),                           # (128,64) -> 128x128
        pad_to(np.asarray(wf1, np.float32).T, (LANES, LANES)),# (64,32)  -> 128x128
    ])                                                        # (4,128,128)

    consts = np.zeros((CONST_ROWS, LANES), np.float32)
    consts[ROW_B1] = b1f[0]
    consts[ROW_B2] = b2f[0]
    consts[ROW_B3, :b3f.shape[1]] = b3f[0]
    consts[ROW_BF1, :FEAT_HID] = np.asarray(bf1, np.float32)
    consts[ROW_WF2, :FEAT_HID] = np.asarray(wf2, np.float32)[0]
    consts[ROW_BF2, :] = float(np.asarray(bf2, np.float32)[0])
    lpos = np.arange(TOTAL2) & (L2 - 1)          # lane position within channel
    for r, d in enumerate(POOL_TAPS):
        valid = (lpos + d >= 0) & (lpos + d < L2)
        consts[ROW_MASK + r] = np.where(valid, 0.0, -1e30).astype(np.float32)

    return jnp.asarray(weights, jnp.bfloat16), jnp.asarray(consts, jnp.float32)


# ----------------------------- pure-JAX reference ----------------------------
def reference_forward(x, w1, b1, w2, b2, w3, b3, wf1, bf1, wf2, bf2):
    def conv1d(h, w, b, stride, padding):
        y = lax.conv_general_dilated(h, w, (stride,), [(padding, padding)],
                                     dimension_numbers=("NCH", "OIH", "NCH"))
        return y + b[None, :, None]

    h = x[:, None, :]                              # (B, 1, L) == NCW
    h = jax.nn.relu(conv1d(h, w1, b1, 1, 1))
    h = conv1d(h, w2, b2, 2, 3)
    h = lax.reduce_window(h, -jnp.inf, lax.max, (1, 1, 5), (1, 1, 1),
                          [(0, 0), (0, 0), (2, 2)])
    h = jax.nn.relu(h)
    h = jax.nn.relu(conv1d(h, w3, b3, 4, 4))
    h = h.reshape(h.shape[0], -1)                  # flatten(1, 2)
    h = jax.nn.relu(h @ wf1.T + bf1)
    return h @ wf2.T + bf2


# ----------------------------- main ------------------------------------------
if __name__ == "__main__":
    key = jax.random.PRNGKey(0)
    ks = jax.random.split(key, 12)

    # Deterministic synthetic parameters (PyTorch layouts: conv (O,I,K),
    # linear (out, in)).
    w1 = jax.random.normal(ks[0], (C1, 1, 3), jnp.float32) * 0.5
    b1 = jax.random.normal(ks[1], (C1,), jnp.float32) * 0.1
    w2 = jax.random.normal(ks[2], (C2, C1, 7), jnp.float32) * 0.2
    b2 = jax.random.normal(ks[3], (C2,), jnp.float32) * 0.1
    w3 = jax.random.normal(ks[4], (C3, C2, 9), jnp.float32) * 0.12
    b3 = jax.random.normal(ks[5], (C3,), jnp.float32) * 0.1
    wf1 = jax.random.normal(ks[6], (FEAT_HID, FEAT_IN), jnp.float32) * 0.12
    bf1 = jax.random.normal(ks[7], (FEAT_HID,), jnp.float32) * 0.1
    wf2 = jax.random.normal(ks[8], (1, FEAT_HID), jnp.float32) * 0.18
    bf2 = jax.random.normal(ks[9], (1,), jnp.float32) * 0.1

    weights, consts = build_kernel_params(
        np.asarray(w1), np.asarray(b1), np.asarray(w2), np.asarray(b2),
        np.asarray(w3), np.asarray(b3), np.asarray(wf1), np.asarray(bf1),
        np.asarray(wf2), np.asarray(bf2))

    # Small-batch path (single padded tile, grid=(1,)).
    x_small = jax.random.normal(ks[10], (8, N_PAST), jnp.float32)
    out_small = jax.block_until_ready(filters_fully_connected(x_small, weights, consts))
    ref_small = jax.block_until_ready(
        reference_forward(x_small, w1, b1, w2, b2, w3, b3, wf1, bf1, wf2, bf2))
    np.testing.assert_allclose(np.asarray(out_small), np.asarray(ref_small),
                               rtol=5e-2, atol=5e-2)
    assert out_small.shape == (8, 1)

    # Batched path (256-row MXU-filling tiles, grid=(2,), parallel batch axis).
    x_big = jax.random.normal(ks[11], (512, N_PAST), jnp.float32)
    out_big = jax.block_until_ready(filters_fully_connected(x_big, weights, consts))
    ref_big = jax.block_until_ready(
        reference_forward(x_big, w1, b1, w2, b2, w3, b3, wf1, bf1, wf2, bf2))
    np.testing.assert_allclose(np.asarray(out_big), np.asarray(ref_big),
                               rtol=5e-2, atol=5e-2)
    assert out_big.shape == (512, 1)

    print("KERNEL_OK")
</pallas_src>

<mosaic_0001>
module attributes {stable_mosaic.version = 11 : i64} {
  func.func @ffc_kernel(%arg0: i32, %arg1: memref<8x128xf32, #tpu.memory_space<vmem>>, %arg2: memref<4x128x128xbf16, #tpu.memory_space<vmem>>, %arg3: memref<16x128xf32, #tpu.memory_space<vmem>>, %arg4: memref<8x128xf32, #tpu.memory_space<vmem>>) attributes {dimension_semantics = [#tpu.dimension_semantics<parallel>], iteration_bounds = array<i64: 1>, scalar_prefetch = 0 : i64, scratch_operands = 0 : i64, tpu.core_type = #tpu.core_type<tc>, window_params = [{transform_indices = @transform_0, window_bounds = array<i64: 8, 128>}, {pipeline_mode = #tpu.pipeline_mode<synchronous>, transform_indices = @transform_1, window_bounds = array<i64: 4, 128, 128>}, {pipeline_mode = #tpu.pipeline_mode<synchronous>, transform_indices = @transform_2, window_bounds = array<i64: 16, 128>}, {transform_indices = @transform_3, window_bounds = array<i64: 8, 128>}]} {
    %c0 = arith.constant 0 : index
    %c0_0 = arith.constant 0 : index
    %0 = vector.load %arg1[%c0, %c0_0] : memref<8x128xf32, #tpu.memory_space<vmem>>, vector<8x128xf32>
    %1 = arith.truncf %0 : vector<8x128xf32> to vector<8x128xbf16>
    %c0_1 = arith.constant 0 : index
    %c0_2 = arith.constant 0 : index
    %c0_3 = arith.constant 0 : index
    %2 = vector.load %arg2[%c0_1, %c0_2, %c0_3] : memref<4x128x128xbf16, #tpu.memory_space<vmem>>, vector<1x128x128xbf16>
    %3 = vector.shape_cast %2 : vector<1x128x128xbf16> to vector<128x128xbf16>
    %cst = arith.constant dense<0.000000e+00> : vector<8x128xf32>
    %4 = tpu.matmul %1, %3, %cst {dimension_numbers = #tpu.dot_dimension_numbers<[1], [0], [0], [1], [0, 0, 1, 1], [], []>} : vector<8x128xbf16>, vector<128x128xbf16>, vector<8x128xf32> -> vector<8x128xf32>
    %c0_4 = arith.constant 0 : index
    %c0_5 = arith.constant 0 : index
    %5 = vector.load %arg3[%c0_4, %c0_5] : memref<16x128xf32, #tpu.memory_space<vmem>>, vector<1x128xf32>
    %6 = vector.broadcast %5 : vector<1x128xf32> to vector<8x128xf32>
    %7 = arith.addf %4, %6 : vector<8x128xf32>
    %cst_6 = arith.constant 0.000000e+00 : f32
    %8 = vector.broadcast %cst_6 : f32 to vector<8x128xf32>
    %9 = arith.maximumf %7, %8 : vector<8x128xf32>
    %10 = arith.truncf %9 : vector<8x128xf32> to vector<8x128xbf16>
    %c1 = arith.constant 1 : index
    %c0_7 = arith.constant 0 : index
    %c0_8 = arith.constant 0 : index
    %11 = vector.load %arg2[%c1, %c0_7, %c0_8] : memref<4x128x128xbf16, #tpu.memory_space<vmem>>, vector<1x128x128xbf16>
    %12 = vector.shape_cast %11 : vector<1x128x128xbf16> to vector<128x128xbf16>
    %cst_9 = arith.constant dense<0.000000e+00> : vector<8x128xf32>
    %13 = tpu.matmul %10, %12, %cst_9 {dimension_numbers = #tpu.dot_dimension_numbers<[1], [0], [0], [1], [0, 0, 1, 1], [], []>} : vector<8x128xbf16>, vector<128x128xbf16>, vector<8x128xf32> -> vector<8x128xf32>
    %c1_10 = arith.constant 1 : index
    %c0_11 = arith.constant 0 : index
    %14 = vector.load %arg3[%c1_10, %c0_11] : memref<16x128xf32, #tpu.memory_space<vmem>>, vector<1x128xf32>
    %15 = vector.broadcast %14 : vector<1x128xf32> to vector<8x128xf32>
    %16 = arith.addf %13, %15 : vector<8x128xf32>
    %c2_i32 = arith.constant 2 : i32
    %17 = tpu.dynamic_rotate %16 by %c2_i32 dim 1 : vector<8x128xf32>, i32 -> vector<8x128xf32>
    %c6 = arith.constant 6 : index
    %c0_12 = arith.constant 0 : index
    %18 = vector.load %arg3[%c6, %c0_12] : memref<16x128xf32, #tpu.memory_space<vmem>>, vector<1x128xf32>
    %19 = vector.broadcast %18 : vector<1x128xf32> to vector<8x128xf32>
    %20 = arith.addf %17, %19 : vector<8x128xf32>
    %c1_i32 = arith.constant 1 : i32
    %21 = tpu.dynamic_rotate %16 by %c1_i32 dim 1 : vector<8x128xf32>, i32 -> vector<8x128xf32>
    %c7 = arith.constant 7 : index
    %c0_13 = arith.constant 0 : index
    %22 = vector.load %arg3[%c7, %c0_13] : memref<16x128xf32, #tpu.memory_space<vmem>>, vector<1x128xf32>
    %23 = vector.broadcast %22 : vector<1x128xf32> to vector<8x128xf32>
    %24 = arith.addf %21, %23 : vector<8x128xf32>
    %c127_i32 = arith.constant 127 : i32
    %25 = tpu.dynamic_rotate %16 by %c127_i32 dim 1 : vector<8x128xf32>, i32 -> vector<8x128xf32>
    %c8 = arith.constant 8 : index
    %c0_14 = arith.constant 0 : index
    %26 = vector.load %arg3[%c8, %c0_14] : memref<16x128xf32, #tpu.memory_space<vmem>>, vector<1x128xf32>
    %27 = vector.broadcast %26 : vector<1x128xf32> to vector<8x128xf32>
    %28 = arith.addf %25, %27 : vector<8x128xf32>
    %c126_i32 = arith.constant 126 : i32
    %29 = tpu.dynamic_rotate %16 by %c126_i32 dim 1 : vector<8x128xf32>, i32 -> vector<8x128xf32>
    %c9 = arith.constant 9 : index
    %c0_15 = arith.constant 0 : index
    %30 = vector.load %arg3[%c9, %c0_15] : memref<16x128xf32, #tpu.memory_space<vmem>>, vector<1x128xf32>
    %31 = vector.broadcast %30 : vector<1x128xf32> to vector<8x128xf32>
    %32 = arith.addf %29, %31 : vector<8x128xf32>
    %33 = arith.maximumf %20, %24 : vector<8x128xf32>
    %34 = arith.maximumf %28, %32 : vector<8x128xf32>
    %35 = arith.maximumf %33, %34 : vector<8x128xf32>
    %36 = arith.maximumf %16, %35 : vector<8x128xf32>
    %cst_16 = arith.constant 0.000000e+00 : f32
    %37 = vector.broadcast %cst_16 : f32 to vector<8x128xf32>
    %38 = arith.maximumf %36, %37 : vector<8x128xf32>
    %39 = arith.truncf %38 : vector<8x128xf32> to vector<8x128xbf16>
    %c2 = arith.constant 2 : index
    %c0_17 = arith.constant 0 : index
    %c0_18 = arith.constant 0 : index
    %40 = vector.load %arg2[%c2, %c0_17, %c0_18] : memref<4x128x128xbf16, #tpu.memory_space<vmem>>, vector<1x128x128xbf16>
    %41 = vector.shape_cast %40 : vector<1x128x128xbf16> to vector<128x128xbf16>
    %cst_19 = arith.constant dense<0.000000e+00> : vector<8x128xf32>
    %42 = tpu.matmul %39, %41, %cst_19 {dimension_numbers = #tpu.dot_dimension_numbers<[1], [0], [0], [1], [0, 0, 1, 1], [], []>} : vector<8x128xbf16>, vector<128x128xbf16>, vector<8x128xf32> -> vector<8x128xf32>
    %c2_20 = arith.constant 2 : index
    %c0_21 = arith.constant 0 : index
    %43 = vector.load %arg3[%c2_20, %c0_21] : memref<16x128xf32, #tpu.memory_space<vmem>>, vector<1x128xf32>
    %44 = vector.broadcast %43 : vector<1x128xf32> to vector<8x128xf32>
    %45 = arith.addf %42, %44 : vector<8x128xf32>
    %cst_22 = arith.constant 0.000000e+00 : f32
    %46 = vector.broadcast %cst_22 : f32 to vector<8x128xf32>
    %47 = arith.maximumf %45, %46 : vector<8x128xf32>
    %48 = arith.truncf %47 : vector<8x128xf32> to vector<8x128xbf16>
    %c3 = arith.constant 3 : index
    %c0_23 = arith.constant 0 : index
    %c0_24 = arith.constant 0 : index
    %49 = vector.load %arg2[%c3, %c0_23, %c0_24] : memref<4x128x128xbf16, #tpu.memory_space<vmem>>, vector<1x128x128xbf16>
    %50 = vector.shape_cast %49 : vector<1x128x128xbf16> to vector<128x128xbf16>
    %cst_25 = arith.constant dense<0.000000e+00> : vector<8x128xf32>
    %51 = tpu.matmul %48, %50, %cst_25 {dimension_numbers = #tpu.dot_dimension_numbers<[1], [0], [0], [1], [0, 0, 1, 1], [], []>} : vector<8x128xbf16>, vector<128x128xbf16>, vector<8x128xf32> -> vector<8x128xf32>
    %c3_26 = arith.constant 3 : index
    %c0_27 = arith.constant 0 : index
    %52 = vector.load %arg3[%c3_26, %c0_27] : memref<16x128xf32, #tpu.memory_space<vmem>>, vector<1x128xf32>
    %53 = vector.broadcast %52 : vector<1x128xf32> to vector<8x128xf32>
    %54 = arith.addf %51, %53 : vector<8x128xf32>
    %cst_28 = arith.constant 0.000000e+00 : f32
    %55 = vector.broadcast %cst_28 : f32 to vector<8x128xf32>
    %56 = arith.maximumf %54, %55 : vector<8x128xf32>
    %c4 = arith.constant 4 : index
    %c0_29 = arith.constant 0 : index
    %57 = vector.load %arg3[%c4, %c0_29] : memref<16x128xf32, #tpu.memory_space<vmem>>, vector<1x128xf32>
    %58 = vector.broadcast %57 : vector<1x128xf32> to vector<8x128xf32>
    %59 = arith.mulf %56, %58 : vector<8x128xf32>
    %cst_30 = arith.constant dense<0.000000e+00> : vector<8xf32>
    %60 = vector.multi_reduction <add>, %59, %cst_30 [1] : vector<8x128xf32> to vector<8xf32>
    %61 = vector.shape_cast %60 : vector<8xf32> to vector<8x1xf32>
    %62 = vector.shape_cast %61 : vector<8x1xf32> to vector<8x1xf32>
    %63 = vector.broadcast %62 : vector<8x1xf32> to vector<8x128xf32>
    %c5 = arith.constant 5 : index
    %c0_31 = arith.constant 0 : index
    %64 = vector.load %arg3[%c5, %c0_31] : memref<16x128xf32, #tpu.memory_space<vmem>>, vector<1x128xf32>
    %65 = vector.broadcast %64 : vector<1x128xf32> to vector<8x128xf32>
    %66 = arith.addf %63, %65 : vector<8x128xf32>
    %c0_32 = arith.constant 0 : index
    %c0_33 = arith.constant 0 : index
    %67 = vector.load %arg4[%c0_32, %c0_33] : memref<8x128xf32, #tpu.memory_space<vmem>>, vector<8x128xf32>
    tpu.vector_store %arg4[%c0_32, %c0_33], %66 {strides = array<i32>} : memref<8x128xf32, #tpu.memory_space<vmem>>, vector<8x128xf32>,
    return
  }
  func.func @transform_0(%arg0: i32) -> (i32, i32) {
    %c0_i32 = arith.constant 0 : i32
    %c0_i32_0 = arith.constant 0 : i32
    return %arg0, %c0_i32 : i32, i32
  }
  func.func @transform_1(%arg0: i32) -> (i32, i32, i32) {
    %c0_i32 = arith.constant 0 : i32
    %c0_i32_0 = arith.constant 0 : i32
    %c0_i32_1 = arith.constant 0 : i32
    %c0_i32_2 = arith.constant 0 : i32
    return %c0_i32, %c0_i32_0, %c0_i32_1 : i32, i32, i32
  }
  func.func @transform_2(%arg0: i32) -> (i32, i32) {
    %c0_i32 = arith.constant 0 : i32
    %c0_i32_0 = arith.constant 0 : i32
    %c0_i32_1 = arith.constant 0 : i32
    return %c0_i32, %c0_i32_0 : i32, i32
  }
  func.func @transform_3(%arg0: i32) -> (i32, i32) {
    %c0_i32 = arith.constant 0 : i32
    %c0_i32_0 = arith.constant 0 : i32
    return %arg0, %c0_i32 : i32, i32
  }
}

</mosaic_0001>

<bundles_post_ra>
// kernel: tpu_custom_call.1
= control target key start
LH: loop header
LB: loop body
LE: loop exit
PB: predicated region body
PF: predicated region fallthrough
CT: control target
= control target key end

     0   :  { %8 = vsyncpa [#allocation3], 0  ;;  %s946_s0 = inlined_call_operand.hbm [shape: f32[8,128], index: 0, kind: input, shape index: {}]   ;;  %s947_s1 = inlined_call_operand.hbm [shape: bf16[4,128,128], index: 1, kind: input, shape index: {}]   ;;  %s948_s2 = inlined_call_operand.hbm [shape: f32[16,128], index: 2, kind: input, shape index: {}]   ;;  %s949_s3 = inlined_call_operand.hbm [shape: f32[8,128], index: 3, kind: output, shape index: {}]  }
   0x1   :  { %9 = vsyncpa [#allocation6], 0 }
   0x2   :  { %10 = vsyncpa [#allocation4], 0  ;;  %s860_s12 = smov [#allocation5]  }
   0x3   :  { %s26_s13 = sshll.u32 %s860_s12, 4  ;;  %s27_s13 = int_to_ptr.vmem [resolvable:$true] %s26_s13 }
   0x4   :  { %s782_s14 = scalar_lea.vmem %s27_s13, 4096  ;;  %p787_p1 = scmp.lt.s32.totalorder %s27_s13, %s27_s13 }
   0x5   :  { %p783_p0 = scmp.ne.s32.totalorder %s27_s13, %s782_s14  ;;  %p788_p2 = scmp.lt.s32.totalorder %s782_s14, %s782_s14 }
   0x7   :  { %p789_p3 = por %p788_p2, %p787_p1 }
   0x9   :  { %p790_p4 = pnand %p789_p3, %p783_p0 }
   0xb   :  { %793 = shalt.err (!%p790_p4)
}
   0xc   :  { %s861_s15 = smov 64   ;;  %s862_s16 = smov 4  }
   0xd   :  { %32 = dma.hbm_to_vmem [thread:$0]  %s947_s1, 4096, %s27_s13, [#allocation6], %s861_s15, %s861_s15, %s862_s16  }
   0xe   :  { %s863_s19 = smov [#allocation2]   ;;  %s864_s21 = smov [#allocation7]  }
   0xf   :  { %s17_s20 = sshll.u32 %s863_s19, 4  ;;  %s38_s22 = sshll.u32 %s864_s21, 4  ;;  %s18_s20 = int_to_ptr.vmem [resolvable:$true] %s17_s20  ;;  %s39_s22 = int_to_ptr.vmem [resolvable:$true] %s38_s22 }
  0x10   :  { %s802_s23 = scalar_lea.vmem %s18_s20, 128  ;;  %p807_p6 = scmp.lt.s32.totalorder %s18_s20, %s18_s20 }
  0x11   :  { %p803_p5 = scmp.ne.s32.totalorder %s18_s20, %s802_s23  ;;  %p808_p7 = scmp.lt.s32.totalorder %s802_s23, %s802_s23 }
  0x13   :  { %p809_p8 = por %p808_p7, %p807_p6 }
  0x15   :  { %p810_p9 = pnand %p809_p8, %p803_p5 }
  0x17   :  { %813 = shalt.err (!%p810_p9)
}
  0x18   :  { %20 = dma.hbm_to_vmem [thread:$0]  %s946_s0, 128, %s18_s20, [#allocation3]  }
  0x19   :  { %s822_s26 = scalar_lea.vmem %s39_s22, 256  ;;  %p827_p11 = scmp.lt.s32.totalorder %s39_s22, %s39_s22 }
  0x1a   :  { %p823_p10 = scmp.ne.s32.totalorder %s39_s22, %s822_s26  ;;  %p828_p12 = scmp.lt.s32.totalorder %s822_s26, %s822_s26 }
  0x1c   :  { %p829_p13 = por %p828_p12, %p827_p11 }
  0x1e   :  { %p830_p0 = pnand %p829_p13, %p823_p10 }
  0x20   :  { %833 = shalt.err (!%p830_p0)
}
  0x21   :  { %s865_s1 = smov 128   ;;  %s866_s27 = smov 8  }
  0x22   :  { %44 = dma.hbm_to_vmem [thread:$0]  %s948_s2, 256, %s39_s22, [#allocation6], %s865_s1, %s865_s1, %s866_s27  }
  0x23   :  { %854 = dma.done.wait [#allocation3], 128  }
  0x24   :  { %855 = vsyncadd [#allocation3], 4294967168 }
  0x25   :  { %856 = dma.done.wait [#allocation6], 4352  }
  0x26   :  { %857 = vsyncadd [#allocation6], 4294962944  ;;  %v867_v0 = vmov 0.0   ;;  %vm868_vm0 = vmmov 0   ;;  %v742_v1 = vld [vmem:[#allocation5 + $0x38] sm:$0xff]   ;;  %v743_v2 = vld [vmem:[#allocation5 + $0x30] sm:$0xff]  }
  0x27   :  { %648 = vmatprep.subr.bf16.mxu0 %v867_v0  ;;  %664 = vmatprep.mubr.msk.bf16.mxu0 %vm868_vm0, %v867_v0  ;;  %v744_v3 = vld [vmem:[#allocation5 + $0x28] sm:$0xff]   ;;  %v750_v4 = vld [vmem:[#allocation5 + $0x78] sm:$0xff]   ;;  %v745_v5 = vld [vmem:[#allocation5 + $0x20] sm:$0xff]   ;;  %s869_s0 = smov 127   ;;  %s870_s2 = smov 2  }
  0x28   :  { %668 = vmatprep.subr.bf16.mxu1 %v867_v0  ;;  %684 = vmatprep.mubr.msk.bf16.mxu1 %vm868_vm0, %v867_v0  ;;  %v751_v6 = vld [vmem:[#allocation5 + $0x70] sm:$0xff]   ;;  %v746_v7 = vld [vmem:[#allocation5 + $0x18] sm:$0xff]   ;;  %v752_v8 = vld [vmem:[#allocation5 + $0x68] sm:$0xff]   ;;  %s871_s30 = smov 126   ;;  %s872_s4 = smov 1  }
  0x29   :  { %649 = vmatpush3.bf16.msra.mxu0 %v742_v1  ;;  %669 = vmatpush3.bf16.msra.mxu1 %v750_v4  ;;  %v747_v9 = vld [vmem:[#allocation5 + $0x10] sm:$0xff]   ;;  %v753_v10 = vld [vmem:[#allocation5 + $0x60] sm:$0xff]   ;;  %v748_v11 = vld [vmem:[#allocation5 + $0x8] sm:$0xff]   ;;  %s873_s5 = smov [#allocation8]  }
  0x2a   :  { %650 = vmatprep.subr.bf16.mxu0 %v867_v0  ;;  %670 = vmatprep.subr.bf16.mxu1 %v867_v0  ;;  %v754_v12 = vld [vmem:[#allocation5 + $0x58] sm:$0xff]   ;;  %v749_v13 = vld [vmem:[#allocation5] sm:$0xff]   ;;  %v755_v15 = vld [vmem:[#allocation5 + $0x50] sm:$0xff]   ;;  %s560_s6 = sshll.u32 %s873_s5, 4  ;;  %s561_s6 = int_to_ptr.vmem [resolvable:$true] %s560_s6 }
  0x2b   :  { %v55_v14 = vld [vmem:[#allocation2] sm:$0xff]  ;;  %v756_v17 = vld [vmem:[#allocation5 + $0x48] sm:$0xff]   ;;  %v757_v18 = vld [vmem:[#allocation5 + $0x40] sm:$0xff]   ;;  %s834_s7 = scalar_lea.vmem %s561_s6, 128  ;;  %p839_p2 = scmp.lt.s32.totalorder %s561_s6, %s561_s6 }
  0x2c   :  { %v56_v16 = vpack.c.bf16 %v55_v14, %v55_v14  ;;  %v570_v19 = vld [vmem:[#allocation7] ss:$0 sm:$0xff]  ;;  %v758_v27 = vld [vmem:[#allocation5 + $0xb8] sm:$0xff]   ;;  %v759_v28 = vld [vmem:[#allocation5 + $0xb0] sm:$0xff]   ;;  %p835_p1 = scmp.ne.s32.totalorder %s561_s6, %s834_s7  ;;  %p840_p3 = scmp.lt.s32.totalorder %s834_s7, %s834_s7 }
  0x2d   :  { %651 = vmatpush3.bf16.msra.mxu0 %v743_v2  ;;  %671 = vmatpush3.bf16.msra.mxu1 %v751_v6  ;;  %v760_v29 = vld [vmem:[#allocation5 + $0xa8] sm:$0xff]   ;;  %v761_v30 = vld [vmem:[#allocation5 + $0xa0] sm:$0xff]   ;;  %v762_v31 = vld [vmem:[#allocation5 + $0x98] sm:$0xff]  }
  0x2e   :  { %652 = vmatprep.subr.bf16.mxu0 %v867_v0  ;;  %672 = vmatprep.subr.bf16.mxu1 %v867_v0  ;;  %v763_v32 = vld [vmem:[#allocation5 + $0x90] sm:$0xff]   ;;  %v764_v33 = vld [vmem:[#allocation5 + $0x88] sm:$0xff]   ;;  %v579_v34 = vld [vmem:[#allocation7 + $0x1] ss:$0 sm:$0xff]  ;;  %p841_p4 = por %p840_p3, %p839_p2 }
  0x2f   :  { %v765_v37 = vld [vmem:[#allocation5 + $0x80] sm:$0xff]   ;;  %v766_v41 = vld [vmem:[#allocation5 + $0xf8] sm:$0xff]   ;;  %v767_v42 = vld [vmem:[#allocation5 + $0xf0] sm:$0xff]  }
  0x30   :  { %v768_v43 = vld [vmem:[#allocation5 + $0xe8] sm:$0xff]   ;;  %v769_v44 = vld [vmem:[#allocation5 + $0xe0] sm:$0xff]   ;;  %v770_v45 = vld [vmem:[#allocation5 + $0xd8] sm:$0xff]   ;;  %p842_p5 = pnand %p841_p4, %p835_p1 }
  0x31   :  { %653 = vmatpush3.bf16.msra.mxu0 %v744_v3  ;;  %673 = vmatpush3.bf16.msra.mxu1 %v752_v8  ;;  %v771_v46 = vld [vmem:[#allocation5 + $0xd0] sm:$0xff]   ;;  %v590_v49 = vld [vmem:[#allocation7 + $0x8] ss:$0 sm:$0xff]  ;;  %v588_v50 = vld [vmem:[#allocation7 + $0x6] ss:$0 sm:$0xff] }
  0x32   :  { %654 = vmatprep.subr.bf16.mxu0 %v867_v0  ;;  %674 = vmatprep.subr.bf16.mxu1 %v867_v0  ;;  %v591_v51 = vld [vmem:[#allocation7 + $0x9] ss:$0 sm:$0xff]  ;;  %v589_v52 = vld [vmem:[#allocation7 + $0x7] ss:$0 sm:$0xff]  ;;  %v592_v4 = vld [vmem:[#allocation7 + $0x2] ss:$0 sm:$0xff] }
  0x33   :  { %v772_v2 = vld [vmem:[#allocation5 + $0xc8] sm:$0xff]   ;;  %v773_v3 = vld [vmem:[#allocation5 + $0xc0] sm:$0xff]  }
  0x35   :  { %655 = vmatpush3.bf16.msra.mxu0 %v745_v5  ;;  %675 = vmatpush3.bf16.msra.mxu1 %v753_v10 }
  0x36   :  { %656 = vmatprep.subr.bf16.mxu0 %v867_v0  ;;  %676 = vmatprep.subr.bf16.mxu1 %v867_v0 }
  0x39   :  { %657 = vmatpush3.bf16.msra.mxu0 %v746_v7  ;;  %677 = vmatpush3.bf16.msra.mxu1 %v754_v12  ;;  %v601_v12 = vld [vmem:[#allocation7 + $0x3] ss:$0 sm:$0xff] }
  0x3a   :  { %658 = vmatprep.subr.bf16.mxu0 %v867_v0  ;;  %678 = vmatprep.subr.bf16.mxu1 %v867_v0 }
  0x3d   :  { %659 = vmatpush3.bf16.msra.mxu0 %v747_v9  ;;  %679 = vmatpush3.bf16.msra.mxu1 %v755_v15 }
  0x3e   :  { %660 = vmatprep.subr.bf16.mxu0 %v867_v0  ;;  %680 = vmatprep.subr.bf16.mxu1 %v867_v0 }
  0x41   :  { %661 = vmatpush3.bf16.msra.mxu0 %v748_v11  ;;  %681 = vmatpush3.bf16.msra.mxu1 %v756_v17 }
  0x42   :  { %662 = vmatprep.subr.bf16.mxu0 %v867_v0  ;;  %682 = vmatprep.subr.bf16.mxu1 %v867_v0 }
  0x45   :  { %663 = vmatpush3.bf16.msra.mxu0 %v749_v13  ;;  %683 = vmatpush3.bf16.msra.mxu1 %v757_v18 }
  0x46   :  { %688 = vmatprep.subr.bf16.mxu0 %v867_v0  ;;  %708 = vmatprep.subr.bf16.mxu1 %v867_v0 }
  0x48   :  { %665 = vmatmul.mubr.bf16.vlgmr.msra.gmra.mxu0 %v56_v16  ;;  %v610_v16 = vld [vmem:[#allocation7 + $0x4] ss:$0 sm:$0xff] }
  0x49   :  { %704 = vmatprep.mubr.msk.bf16.mxu0 %vm868_vm0, %v867_v0  ;;  %689 = vmatpush3.bf16.msra.mxu0 %v758_v27 }
  0x4a   :  { %690 = vmatprep.subr.bf16.mxu0 %v867_v0 }
  0x4d   :  { %691 = vmatpush3.bf16.msra.mxu0 %v759_v28 }
  0x4e   :  { %692 = vmatprep.subr.bf16.mxu0 %v867_v0 }
  0x51   :  { %693 = vmatpush3.bf16.msra.mxu0 %v760_v29 }
  0x52   :  { %694 = vmatprep.subr.bf16.mxu0 %v867_v0 }
  0x55   :  { %695 = vmatpush3.bf16.msra.mxu0 %v761_v30 }
  0x56   :  { %696 = vmatprep.subr.bf16.mxu0 %v867_v0 }
  0x59   :  { %697 = vmatpush3.bf16.msra.mxu0 %v762_v31 }
  0x5a   :  { %698 = vmatprep.subr.bf16.mxu0 %v867_v0 }
  0x5d   :  { %699 = vmatpush3.bf16.msra.mxu0 %v763_v32 }
  0x5e   :  { %700 = vmatprep.subr.bf16.mxu0 %v867_v0 }
  0x61   :  { %701 = vmatpush3.bf16.msra.mxu0 %v764_v33 }
  0x62   :  { %702 = vmatprep.subr.bf16.mxu0 %v867_v0 }
  0x65   :  { %703 = vmatpush3.bf16.msra.mxu0 %v765_v37 }
 0x108   :  { %v160_v20 = vpop.f32.mrf.mxu0 }
 0x109   :  { %v161_v21 = vadd.f32 %v570_v19, %v160_v20  ;;  %v611_v20 = vld [vmem:[#allocation7 + $0x5] ss:$0 sm:$0xff] }
 0x10a   :  { %v666_v22 = vpop.f32.mrf.mxu0 }
 0x10b   :  { %v166_v23 = vmax.f32 %v161_v21, 0.0 }
 0x10c   :  { %v163_v24 = vpop.f32.mrf.mxu0 }
 0x10d   :  { %v167_v25 = vpack.c.bf16 %v166_v23, %v166_v23 }
 0x10e   :  { %v667_v26 = vpop.f32.mrf.mxu0 }
 0x10f   :  { %685 = vmatmul.mubr.bf16.vlgmr.msra.gmra.mxu1 %v167_v25 }
 0x110   :  { %724 = vmatprep.mubr.msk.bf16.mxu1 %vm868_vm0, %v867_v0  ;;  %709 = vmatpush3.bf16.msra.mxu1 %v766_v41 }
 0x111   :  { %710 = vmatprep.subr.bf16.mxu1 %v867_v0 }
 0x114   :  { %711 = vmatpush3.bf16.msra.mxu1 %v767_v42 }
 0x115   :  { %712 = vmatprep.subr.bf16.mxu1 %v867_v0 }
 0x118   :  { %713 = vmatpush3.bf16.msra.mxu1 %v768_v43 }
 0x119   :  { %714 = vmatprep.subr.bf16.mxu1 %v867_v0 }
 0x11c   :  { %715 = vmatpush3.bf16.msra.mxu1 %v769_v44 }
 0x11d   :  { %716 = vmatprep.subr.bf16.mxu1 %v867_v0 }
 0x120   :  { %717 = vmatpush3.bf16.msra.mxu1 %v770_v45 }
 0x121   :  { %718 = vmatprep.subr.bf16.mxu1 %v867_v0 }
 0x124   :  { %719 = vmatpush3.bf16.msra.mxu1 %v771_v46 }
 0x125   :  { %720 = vmatprep.subr.bf16.mxu1 %v867_v0 }
 0x128   :  { %721 = vmatpush3.bf16.msra.mxu1 %v772_v2 }
 0x129   :  { %722 = vmatprep.subr.bf16.mxu1 %v867_v0 }
 0x12c   :  { %723 = vmatpush3.bf16.msra.mxu1 %v773_v3 }
 0x1cf   :  { %v272_v35 = vpop.f32.mrf.mxu1 }
 0x1d0   :  { %v273_v36 = vadd.f32 %v579_v34, %v272_v35 }
 0x1d1   :  { %v686_v38 = vpop.f32.mrf.mxu1 }
 0x1d2   :  { %294 = vrot.lane.b32.xlu1 %v273_v36, %s869_s0  ;;  %278 = vrot.lane.b32.xlu0 %v273_v36, %s870_s2 }
 0x1d3   :  { %v275_v39 = vpop.f32.mrf.mxu1 }
 0x1d5   :  { %v687_v40 = vpop.f32.mrf.mxu1 }
 0x1d6   :  { %302 = vrot.lane.b32.xlu1 %v273_v36, %s871_s30  ;;  %286 = vrot.lane.b32.xlu0 %v273_v36, %s872_s4 }
 0x244   :  { %v295_v47 = vpop.permute.xlu1 %294  ;;  %v279_v48 = vpop.permute.xlu0 %278 }
 0x245   :  { %v301_v55 = vadd.f32 %v590_v49, %v295_v47  ;;  %v285_v56 = vadd.f32 %v588_v50, %v279_v48 }
 0x248   :  { %v303_v53 = vpop.permute.xlu1 %302  ;;  %v287_v54 = vpop.permute.xlu0 %286 }
 0x249   :  { %v309_v57 = vadd.f32 %v591_v51, %v303_v53  ;;  %v293_v58 = vadd.f32 %v589_v52, %v287_v54 }
 0x24b   :  { %v311_v59 = vmax.f32 %v301_v55, %v309_v57  ;;  %v310_v60 = vmax.f32 %v285_v56, %v293_v58 }
 0x24d   :  { %v312_v61 = vmax.f32 %v310_v60, %v311_v59 }
 0x24f   :  { %v313_v62 = vmax.f32 %v273_v36, %v312_v61 }
 0x251   :  { %v314_v63 = vmax.f32 %v313_v62, 0.0 }
 0x253   :  { %v315_v1 = vpack.c.bf16 %v314_v63, %v314_v63 }
 0x255   :  { %705 = vmatmul.mubr.bf16.vlgmr.msra.gmra.mxu0 %v315_v1 }
 0x315   :  { %v420_v5 = vpop.f32.mrf.mxu0 }
 0x316   :  { %v421_v6 = vadd.f32 %v592_v4, %v420_v5 }
 0x317   :  { %v706_v7 = vpop.f32.mrf.mxu0 }
 0x318   :  { %v426_v8 = vmax.f32 %v421_v6, 0.0 }
 0x319   :  { %v423_v9 = vpop.f32.mrf.mxu0 }
 0x31a   :  { %v427_v10 = vpack.c.bf16 %v426_v8, %v426_v8 }
 0x31b   :  { %v707_v11 = vpop.f32.mrf.mxu0 }
 0x31c   :  { %725 = vmatmul.mubr.bf16.vlgmr.msra.gmra.mxu1 %v427_v10 }
 0x3dc   :  { %v532_v13 = vpop.f32.mrf.mxu1 }
 0x3dd   :  { %v533_v14 = vadd.f32 %v601_v12, %v532_v13 }
 0x3de   :  { %v726_v15 = vpop.f32.mrf.mxu1 }
 0x3df   :  { %v538_v17 = vmax.f32 %v533_v14, 0.0 }
 0x3e0   :  { %v535_v18 = vpop.f32.mrf.mxu1 }
 0x3e1   :  { %v544_v19 = vmul.f32 %v610_v16, %v538_v17 }
 0x3e2   :  { %v727_v0 = vpop.f32.mrf.mxu1 }
 0x3e3   :  { %545 = vadd.xlane.f32.xlu0 %v544_v19 }
 0x46c   :  { %v546_v21 = vpop.xlane.xlu0 %545 }
 0x46d   :  { %v552_v22 = vadd.f32 %v611_v20, %v546_v21 }
 0x46f   :  { %553 = vst [vmem:[#allocation8] sm:$0xff] %v552_v22 }
 0x470   :  { %845 = shalt.err (!%p842_p5)
}
 0x471   :  { %563 = dma.vmem_to_hbm [thread:$0]  %s561_s6, 128, %s949_s3, [#allocation4]  }
 0x472   :  { %858 = dma.done.wait [#allocation4], 128  }
 0x473   :  { %859 = vsyncadd [#allocation4], 4294967168 }
 0x474   :  { %567 = vsyncpa [#allocation3], 1 }
 0x475   :  { %568 = vsyncpa [#allocation6], 1 }
 0x476   :  { %569 = vsyncpa [#allocation4], 1 }

</bundles_post_ra>
